<compile_context>
chip_gen: v7x
topology: tpu7x:2x2x1
jax: 0.10.0
libtpu: 0.0.40
codegen_flags: <defaults>
</compile_context>

<pallas_src>
import functools

import jax
import jax.numpy as jnp
from jax.experimental import pallas as pl
from jax.experimental.pallas import tpu as pltpu

_LANES = 128
_SUBLANES = 8
_VMEM_BUDGET = 24 * 1024 * 1024    # target per-step working set (fits v7x 64 MiB VMEM)
_VMEM_LIMIT = 48 * 1024 * 1024     # scoped VMEM limit handed to Mosaic


def _round_up(x, m):
    return ((x + m - 1) // m) * m


# ----------------------------------------------------------------------------
# Kernel: block = [Bn, C, S_tile, 128] resident in VMEM; reduce over channels.
# ----------------------------------------------------------------------------
def _normalize_kernel(x_ref, o_ref, *, power):
    x = x_ref[...].astype(jnp.float32)                      # [Bn, C, S, 128]
    if power == 2:
        # Fast path: sum of squares over C (VPU adds), rsqrt on the [Bn,1,S,128]
        # row (EUP slot, ~free), broadcast-scale over C.
        ssq = jnp.sum(x * x, axis=1, keepdims=True)
        out = x * jax.lax.rsqrt(ssq)
    else:
        if isinstance(power, int) and power >= 1:
            xp = x
            for _ in range(power - 1):                      # repeated VPU muls
                xp = xp * x
        else:
            xp = jnp.power(x, float(power))
        s = jnp.sum(xp, axis=1, keepdims=True)              # [Bn, 1, S, 128]
        if power == 1:
            norm = s
        else:
            norm = jnp.power(s, 1.0 / float(power))
        # Inverse norm once per spatial column (O(HW) transcendentals), then
        # broadcast-multiply over C.
        out = x * (1.0 / norm)
    o_ref[...] = out.astype(o_ref.dtype)


# ----------------------------------------------------------------------------
# Wrapper
# ----------------------------------------------------------------------------
def normalize(x, power=2):
    """L_p-normalize x over dim 1 (PyTorch `Normalize` forward)."""
    orig_shape = x.shape
    assert x.ndim >= 2, "expects at least [N, C, ...]"
    N, C = int(orig_shape[0]), int(orig_shape[1])
    HW = 1
    for d in orig_shape[2:]:
        HW *= int(d)

    itemsize = jnp.dtype(x.dtype).itemsize
    # Footprint of one "sublane row unit" (C x 1 x 128): double-buffered input
    # + output blocks plus ~2 f32 temporaries (upcast + result).
    unit_bytes = C * _LANES * (4 * itemsize + 2 * 4)

    s_total = max(1, -(-HW // _LANES))                      # ceil(HW / 128)
    s_cap = (_VMEM_BUDGET // unit_bytes) // _SUBLANES * _SUBLANES
    s_tile = max(_SUBLANES, min(_round_up(s_total, _SUBLANES), s_cap, 2048))
    s_pad = _round_up(s_total, s_tile)
    hw_pad = s_pad * _LANES

    # Tiny problems: fold several batch elements into one block when a single
    # spatial tile already covers the whole extent (amortizes per-step cost).
    bn = 1
    if s_pad == s_tile:
        per_batch = s_tile * unit_bytes
        bn_cap = max(1, _VMEM_BUDGET // per_batch)
        for d in range(1, N + 1):
            if N % d == 0 and d <= bn_cap:
                bn = d

    x3 = x.reshape(N, C, HW)
    if hw_pad != HW:
        # Pad spatial columns with 1s: each column normalizes independently,
        # padded columns are sliced off below, and 1s keep them NaN-free.
        x3 = jnp.pad(x3, ((0, 0), (0, 0), (0, hw_pad - HW)), constant_values=1.0)
    x4 = x3.reshape(N, C, s_pad, _LANES)

    grid = (N // bn, s_pad // s_tile)
    block = (bn, C, s_tile, _LANES)

    cost = pl.CostEstimate(
        flops=(int(power) + 2) * N * C * hw_pad,            # pow terms + reduce + scale
        transcendentals=N * hw_pad,                         # rsqrt / pow per column
        bytes_accessed=2 * N * C * hw_pad * itemsize,       # read x + write out
    )

    out = pl.pallas_call(
        functools.partial(_normalize_kernel, power=power),
        out_shape=jax.ShapeDtypeStruct((N, C, s_pad, _LANES), x.dtype),
        grid=grid,
        in_specs=[pl.BlockSpec(block, lambda n, h: (n, 0, h, 0))],
        out_specs=pl.BlockSpec(block, lambda n, h: (n, 0, h, 0)),
        compiler_params=pltpu.CompilerParams(
            dimension_semantics=("parallel", "parallel"),   # v7x: both TCs stream
            vmem_limit_bytes=_VMEM_LIMIT,
        ),
        cost_estimate=cost,
    )(x4)

    out = out.reshape(N, C, hw_pad)
    if hw_pad != HW:
        out = out[:, :, :HW]
    return out.reshape(orig_shape)


# ----------------------------------------------------------------------------
# Pure-JAX reference matching the PyTorch module exactly.
# ----------------------------------------------------------------------------
def ref_normalize(x, power=2):
    norm = jnp.power(
        jnp.sum(jnp.power(x, float(power)), axis=1, keepdims=True),
        1.0 / float(power))
    return x / norm


# ----------------------------------------------------------------------------
if __name__ == "__main__":
    key = jax.random.PRNGKey(0)

    # Normalize(power=2) applied to a small NCHW activation map.
    N, C, H, W = 2, 4, 16, 16
    x = jax.random.normal(key, (N, C, H, W), jnp.float32)

    out = jax.block_until_ready(normalize(x, power=2))
    ref = jax.block_until_ready(ref_normalize(x, power=2))

    assert out.shape == (N, C, H, W), out.shape
    err = float(jnp.max(jnp.abs(out - ref)))
    assert err < 1e-4, f"max abs diff {err}"

    print("KERNEL_OK")
</pallas_src>

<mosaic_0001>
module attributes {stable_mosaic.version = 11 : i64} {
  func.func @_normalize_kernel(%arg0: i32, %arg1: i32, %arg2: memref<2x4x8x128xf32, #tpu.memory_space<vmem>>, %arg3: memref<2x4x8x128xf32, #tpu.memory_space<vmem>>) attributes {dimension_semantics = [#tpu.dimension_semantics<parallel>, #tpu.dimension_semantics<parallel>], iteration_bounds = array<i64: 1, 1>, scalar_prefetch = 0 : i64, scratch_operands = 0 : i64, tpu.core_type = #tpu.core_type<tc>, window_params = [{transform_indices = @transform_0, window_bounds = array<i64: 2, 4, 8, 128>}, {transform_indices = @transform_1, window_bounds = array<i64: 2, 4, 8, 128>}]} {
    %c0 = arith.constant 0 : index
    %c0_0 = arith.constant 0 : index
    %c0_1 = arith.constant 0 : index
    %c0_2 = arith.constant 0 : index
    %0 = vector.load %arg2[%c0, %c0_0, %c0_1, %c0_2] : memref<2x4x8x128xf32, #tpu.memory_space<vmem>>, vector<2x4x8x128xf32>
    %1 = arith.mulf %0, %0 : vector<2x4x8x128xf32>
    %cst = arith.constant dense<0.000000e+00> : vector<2x8x128xf32>
    %2 = vector.multi_reduction <add>, %1, %cst [1] : vector<2x4x8x128xf32> to vector<2x8x128xf32>
    %3 = vector.shape_cast %2 : vector<2x8x128xf32> to vector<2x1x8x128xf32>
    %4 = math.rsqrt %3 : vector<2x1x8x128xf32>
    %5 = vector.broadcast %4 : vector<2x1x8x128xf32> to vector<2x4x8x128xf32>
    %6 = arith.mulf %0, %5 : vector<2x4x8x128xf32>
    %c0_3 = arith.constant 0 : index
    %c0_4 = arith.constant 0 : index
    %c0_5 = arith.constant 0 : index
    %c0_6 = arith.constant 0 : index
    %7 = vector.load %arg3[%c0_3, %c0_4, %c0_5, %c0_6] : memref<2x4x8x128xf32, #tpu.memory_space<vmem>>, vector<2x4x8x128xf32>
    tpu.vector_store %arg3[%c0_3, %c0_4, %c0_5, %c0_6], %6 {strides = array<i32>} : memref<2x4x8x128xf32, #tpu.memory_space<vmem>>, vector<2x4x8x128xf32>,
    return
  }
  func.func @transform_0(%arg0: i32, %arg1: i32) -> (i32, i32, i32, i32) {
    %c0_i32 = arith.constant 0 : i32
    %c0_i32_0 = arith.constant 0 : i32
    %c0_i32_1 = arith.constant 0 : i32
    return %arg0, %c0_i32, %arg1, %c0_i32_0 : i32, i32, i32, i32
  }
  func.func @transform_1(%arg0: i32, %arg1: i32) -> (i32, i32, i32, i32) {
    %c0_i32 = arith.constant 0 : i32
    %c0_i32_0 = arith.constant 0 : i32
    %c0_i32_1 = arith.constant 0 : i32
    return %arg0, %c0_i32, %arg1, %c0_i32_0 : i32, i32, i32, i32
  }
}

</mosaic_0001>

<bundles_post_ra>
// kernel: tpu_custom_call.1
= control target key start
LH: loop header
LB: loop body
LE: loop exit
PB: predicated region body
PF: predicated region fallthrough
CT: control target
= control target key end

     0   :  { %6 = vsyncpa [#allocation3], 0  ;;  %s180_s0 = inlined_call_operand.hbm [shape: f32[2,4,8,128], index: 0, kind: input, shape index: {}]   ;;  %s181_s1 = inlined_call_operand.hbm [shape: f32[2,4,8,128], index: 1, kind: output, shape index: {}]  }
   0x1   :  { %7 = vsyncpa [#allocation4], 0  ;;  %s136_s6 = smov [#allocation2]   ;;  %s88_s10 = scalar_lea.hbm %s180_s0, 1024 }
   0x2   :  { %s13_s7 = sshll.u32 %s136_s6, 4  ;;  %p89_p0 = scmp.ne.s32.totalorder %s180_s0, %s88_s10  ;;  %s14_s7 = int_to_ptr.vmem [resolvable:$true] %s13_s7 }
   0x3   :  { %p92_p1 = scmp.lt.u32.totalorder %s88_s10, %s180_s0 }
   0x5   :  { %p94_p2 = pnand %p92_p1, %p89_p0 }
   0x7   :  { %97 = shalt.err (!%p94_p2)
}
   0x8   :  { %s98_s15 = scalar_lea.vmem %s14_s7, 1024  ;;  %p103_p4 = scmp.lt.s32.totalorder %s14_s7, %s14_s7 }
   0x9   :  { %p99_p3 = scmp.ne.s32.totalorder %s14_s7, %s98_s15  ;;  %p104_p5 = scmp.lt.s32.totalorder %s98_s15, %s98_s15 }
   0xb   :  { %p105_p6 = por %p104_p5, %p103_p4 }
   0xd   :  { %p106_p7 = pnand %p105_p6, %p99_p3 }
   0xf   :  { %109 = shalt.err (!%p106_p7)
}
  0x10   :  { %s137_s16 = smov 128   ;;  %s138_s17 = smov 8  }
  0x11   :  { %19 = dma.hbm_to_vmem [thread:$0]  %s180_s0, 1024, %s14_s7, [#allocation3], %s137_s16, %s137_s16, %s138_s17  }
  0x12   :  { %132 = dma.done.wait [#allocation3], 1024  }
  0x13   :  { %133 = vsyncadd [#allocation3], 4294966272  ;;  %v23_v0 = vld [vmem:[#allocation2] sm:$0xff]  ;;  %v24_v1 = vld [vmem:[#allocation2 + $0x8] sm:$0xff]  ;;  %s139_s0 = smov [#allocation5]  }
  0x14   :  { %v25_v2 = vld [vmem:[#allocation2 + $0x10] sm:$0xff]  ;;  %v26_v3 = vld [vmem:[#allocation2 + $0x18] sm:$0xff]  ;;  %v31_v4 = vmul.f32 %v23_v0, %v23_v0  ;;  %v32_v5 = vmul.f32 %v24_v1, %v24_v1  ;;  %v27_v7 = vld [vmem:[#allocation2 + $0x20] sm:$0xff]  ;;  %s68_s20 = sshll.u32 %s139_s0, 4  ;;  %s69_s20 = int_to_ptr.vmem [resolvable:$true] %s68_s20 }
  0x15   :  { %v33_v6 = vmul.f32 %v25_v2, %v25_v2  ;;  %v28_v8 = vld [vmem:[#allocation2 + $0x28] sm:$0xff]  ;;  %v29_v9 = vld [vmem:[#allocation2 + $0x30] sm:$0xff]  ;;  %v30_v10 = vld [vmem:[#allocation2 + $0x38] sm:$0xff]  ;;  %v35_v11 = vmul.f32 %v27_v7, %v27_v7  ;;  %v34_v13 = vmul.f32 %v26_v3, %v26_v3  ;;  %s110_s21 = scalar_lea.vmem %s69_s20, 1024  ;;  %p115_p9 = scmp.lt.s32.totalorder %s69_s20, %s69_s20 }
  0x16   :  { %v36_v12 = vmul.f32 %v28_v8, %v28_v8  ;;  %v39_v14 = vadd.f32 %v32_v5, %v31_v4  ;;  %v37_v15 = vmul.f32 %v29_v9, %v29_v9  ;;  %v38_v16 = vmul.f32 %v30_v10, %v30_v10  ;;  %p111_p8 = scmp.ne.s32.totalorder %s69_s20, %s110_s21  ;;  %p116_p10 = scmp.lt.s32.totalorder %s110_s21, %s110_s21 }
  0x18   :  { %v42_v17 = vadd.f32 %v36_v12, %v35_v11  ;;  %v40_v18 = vadd.f32 %v39_v14, %v33_v6  ;;  %p117_p11 = por %p116_p10, %p115_p9 }
  0x1a   :  { %v43_v19 = vadd.f32 %v42_v17, %v37_v15  ;;  %v41_v20 = vadd.f32 %v40_v18, %v34_v13  ;;  %p118_p12 = pnand %p117_p11, %p111_p8 }
  0x1c   :  { %v44_v21 = vadd.f32 %v43_v19, %v38_v16  ;;  %84 = vrsqrt.f32 %v41_v20 }
  0x1e   :  { %86 = vrsqrt.f32 %v44_v21 }
  0x26   :  { %v85_v22 = vpop.eup %84 }
  0x27   :  { %v47_v24 = vmul.f32 %v85_v22, %v23_v0  ;;  %v48_v25 = vmul.f32 %v85_v22, %v24_v1  ;;  %v49_v26 = vmul.f32 %v85_v22, %v25_v2  ;;  %v50_v27 = vmul.f32 %v85_v22, %v26_v3 }
  0x28   :  { %v87_v23 = vpop.eup %86 }
  0x29   :  { %v51_v28 = vmul.f32 %v87_v23, %v27_v7  ;;  %v52_v29 = vmul.f32 %v87_v23, %v28_v8  ;;  %v53_v30 = vmul.f32 %v87_v23, %v29_v9  ;;  %v54_v31 = vmul.f32 %v87_v23, %v30_v10  ;;  %55 = vst [vmem:[#allocation5] sm:$0xff] %v47_v24 }
  0x2a   :  { %56 = vst [vmem:[#allocation5 + $0x8] sm:$0xff] %v48_v25  ;;  %57 = vst [vmem:[#allocation5 + $0x10] sm:$0xff] %v49_v26 }
  0x2b   :  { %58 = vst [vmem:[#allocation5 + $0x18] sm:$0xff] %v50_v27  ;;  %59 = vst [vmem:[#allocation5 + $0x20] sm:$0xff] %v51_v28 }
  0x2c   :  { %60 = vst [vmem:[#allocation5 + $0x28] sm:$0xff] %v52_v29  ;;  %61 = vst [vmem:[#allocation5 + $0x30] sm:$0xff] %v53_v30 }
  0x2d   :  { %62 = vst [vmem:[#allocation5 + $0x38] sm:$0xff] %v54_v31 }
  0x2e   :  { %121 = shalt.err (!%p118_p12)
}
  0x2f   :  { %s122_s24 = scalar_lea.hbm %s181_s1, 1024 }
  0x30   :  { %p123_p13 = scmp.ne.s32.totalorder %s181_s1, %s122_s24  ;;  %p126_p0 = scmp.lt.u32.totalorder %s122_s24, %s181_s1 }
  0x32   :  { %p128_p1 = pnand %p126_p0, %p123_p13 }
  0x34   :  { %131 = shalt.err (!%p128_p1)
}
  0x35   :  { %74 = dma.vmem_to_hbm [thread:$0]  %s69_s20, 1024, %s181_s1, [#allocation4], %s137_s16, %s137_s16, %s138_s17  }
  0x36   :  { %134 = dma.done.wait [#allocation4], 1024  }
  0x37   :  { %135 = vsyncadd [#allocation4], 4294966272 }
  0x38   :  { %78 = vsyncpa [#allocation3], 1 }
  0x39   :  { %79 = vsyncpa [#allocation4], 1 }

</bundles_post_ra>
